<compile_context>
chip_gen: v5e
topology: v5e:2x2
jax: 0.10.0
libtpu: 0.0.40
codegen_flags: <defaults>
</compile_context>

<pallas_src>
import numpy as np
import jax
import jax.numpy as jnp
from jax.experimental import pallas as pl
from jax.experimental.pallas import tpu as pltpu

LANE = 128  # TPU lane width


def _round_up(x, m):
    return ((x + m - 1) // m) * m


def attention_kernel(q_ref, u_ref, pm_ref, bias_ref, mem_ref,
                     wq_ref, wfold_ref, v_ref,
                     ctx_ref, attw_ref):
    f32 = jnp.float32

    # Query projection: tiny (A,rnn)@(rnn,1) matvec; the (A,1) column then
    # broadcasts over the Tp lanes on the VPU (no selector matmul).
    pq = jnp.dot(wq_ref[...], q_ref[...], preferred_element_type=f32)      # (A, 1)

    # Location features: folded conv+dense as a single matmul.
    pa = jnp.dot(wfold_ref[...], u_ref[...], preferred_element_type=f32)   # (A, Tp)

    # bf16 -> f32 upcast after the DMA (also required on v5e: no bf16 VPU).
    pm = pm_ref[...].astype(f32)                                           # (A, Tp)

    s = jnp.tanh(pq + pa + pm)                                             # (A, Tp) EUP

    # Energies: VPU broadcast-multiply + XLU sublane reduce over A,
    # additive mask bias (also masks the Tp padding tail).
    e = jnp.sum(v_ref[...] * s, axis=0, keepdims=True) + bias_ref[...]     # (1, Tp)

    # Softmax over the lane-dense time axis.
    e_max = jnp.max(e, axis=1, keepdims=True)
    p = jnp.exp(e - e_max)
    denom = jnp.sum(p, axis=1, keepdims=True)
    w = p * pl.reciprocal(denom, approx=False)                             # (1, Tp)
    attw_ref[...] = w                                                      # full-block store

    # Context: (1,Tp)@(Tp,Ep) matvec, bf16 operands, f32 accumulation.
    ctx_ref[...] = jnp.dot(w.astype(mem_ref.dtype), mem_ref[...],
                           preferred_element_type=f32)                     # (1, Ep)


def prepare_attention_memory(memory, processed_memory, mask):
    """Step-invariant preparation — run ONCE per utterance, not per decoder step.

    Pads T/E to lane multiples, lays processed_memory out as (B, A, Tp),
    builds the additive mask bias and downcasts the big tensors to bf16.
    """
    f32 = jnp.float32
    B, T, E = memory.shape
    A = processed_memory.shape[-1]
    Tp = _round_up(T, LANE)
    Ep = _round_up(E, LANE)

    mem = jnp.pad(memory.astype(f32), ((0, 0), (0, Tp - T), (0, Ep - E)))
    mem = mem.astype(jnp.bfloat16)                                  # (B, Tp, Ep)

    # TODO(synk): in production, emit processed_memory directly in (B, A, T)
    # layout from the memory_layer matmul instead of transposing it here.
    pm = jnp.transpose(processed_memory.astype(f32), (0, 2, 1))     # (B, A, T)
    pm = jnp.pad(pm, ((0, 0), (0, 0), (0, Tp - T)))
    pm = pm.astype(jnp.bfloat16)                                    # (B, A, Tp)

    # Additive bias: 0 for valid, -1e30 for masked and for the Tp pad tail
    # (avoids the exp(-inf) NaN edge case; identical softmax result).
    bias = jnp.where(mask, f32(-1e30), f32(0.0))
    bias = jnp.pad(bias, ((0, 0), (0, Tp - T)), constant_values=-1e30)
    bias = bias.reshape(B, 1, Tp)                                   # (B, 1, Tp)

    return dict(mem=mem, pm=pm, bias=bias, T=T, E=E, Tp=Tp, Ep=Ep)


def attention_forward(query, attention_weights_cat, prepared, params):
    """Per-decoder-step wrapper: layout glue + pallas_call."""
    f32 = jnp.float32
    Wq, Wconv, Wloc, v_row = (params["Wq"], params["Wconv"],
                              params["Wloc"], params["v"])
    mem, pm, bias = prepared["mem"], prepared["pm"], prepared["bias"]
    T, E, Tp, Ep = prepared["T"], prepared["E"], prepared["Tp"], prepared["Ep"]
    B = mem.shape[0]
    A, rnn = Wq.shape
    nf, _, K = Wconv.shape
    P = (K - 1) // 2
    twoK = 2 * K

    # Query as a (B, rnn, 1) stack of columns (no in-kernel transpose needed).
    q_col = query.astype(f32)[:, :, None]                          # (B, rnn, 1)

    # im2col for the location conv, row order [c outer, k inner] so it matches
    # Wconv.reshape(nf, 2K) row-major flattening exactly.
    # TODO(synk): at production K (~31) build these rows in-kernel from the
    # tiny (2, Tp) weights via pltpu.roll instead of DMA'ing the expanded u.
    x = attention_weights_cat.astype(f32)
    xpad = jnp.pad(x, ((0, 0), (0, 0), (P, P)))                     # (B, 2, T+2P)
    rows = []
    for c in range(2):
        for k in range(K):
            sl = xpad[:, c, k:k + T]                                # (B, T)
            sl = jnp.pad(sl, ((0, 0), (0, Tp - T)))
            rows.append(sl[:, None, :])
    u = jnp.concatenate(rows, axis=1)                               # (B, 2K, Tp)

    # Fold location conv + location dense into one (A, 2K) weight.
    wfold = (Wloc.astype(f32) @ Wconv.reshape(nf, twoK).astype(f32))  # (A, 2K)
    v_col = jnp.transpose(v_row).astype(f32)                          # (A, 1)

    in_specs = [
        pl.BlockSpec((None, rnn, 1), lambda b: (b, 0, 0)),    # q
        pl.BlockSpec((None, twoK, Tp), lambda b: (b, 0, 0)),  # u (im2col)
        pl.BlockSpec((None, A, Tp), lambda b: (b, 0, 0)),     # processed_memory
        pl.BlockSpec((None, 1, Tp), lambda b: (b, 0, 0)),     # mask bias
        pl.BlockSpec((None, Tp, Ep), lambda b: (b, 0, 0)),    # memory
        pl.BlockSpec((A, rnn), lambda b: (0, 0)),             # Wq (resident)
        pl.BlockSpec((A, twoK), lambda b: (0, 0)),            # Wfold (resident)
        pl.BlockSpec((A, 1), lambda b: (0, 0)),               # v (resident)
    ]
    out_specs = (
        pl.BlockSpec((None, 1, Ep), lambda b: (b, 0, 0)),     # ctx
        pl.BlockSpec((None, 1, Tp), lambda b: (b, 0, 0)),     # attention weights
    )
    out_shape = (jax.ShapeDtypeStruct((B, 1, Ep), f32),
                 jax.ShapeDtypeStruct((B, 1, Tp), f32))

    ctx3, attw3 = pl.pallas_call(
        attention_kernel,
        grid=(B,),
        in_specs=in_specs,
        out_specs=out_specs,
        out_shape=out_shape,
        compiler_params=pltpu.CompilerParams(
            dimension_semantics=("parallel",),      # batch shards across TCs on v7x
            vmem_limit_bytes=32 * 1024 * 1024),     # per-batch tiles + double buffer
    )(q_col, u, pm, bias, mem, Wq.astype(f32), wfold, v_col)

    ctx = ctx3.reshape(B, Ep)[:, :E]
    attw = attw3.reshape(B, Tp)[:, :T]
    return ctx, attw


def attention_reference(query, memory, processed_memory, attention_weights_cat,
                        mask, params):
    """Pure-JAX f32 reference matching the PyTorch module semantics."""
    Wq, Wconv, Wloc, v_row = (params["Wq"], params["Wconv"],
                              params["Wloc"], params["v"])
    B, T, E = memory.shape
    nf, _, K = Wconv.shape
    P = (K - 1) // 2

    pq = query @ Wq.T                                               # (B, A)
    xpad = jnp.pad(attention_weights_cat, ((0, 0), (0, 0), (P, P)))
    conv = jnp.zeros((B, nf, T), jnp.float32)
    for k in range(K):
        conv = conv + jnp.einsum("bct,fc->bft", xpad[:, :, k:k + T],
                                 Wconv[:, :, k])
    loc = jnp.einsum("bft,af->bta", conv, Wloc)                     # (B, T, A)
    s = jnp.tanh(pq[:, None, :] + loc + processed_memory)
    e = jnp.einsum("bta,a->bt", s, v_row[0])                        # (B, T)
    e = jnp.where(mask, -jnp.inf, e)
    w = jax.nn.softmax(e, axis=1)
    ctx = jnp.einsum("bt,bte->be", w, memory)
    return ctx, w


if __name__ == "__main__":
    B = 2
    T = 16                      # max_time
    attention_rnn_dim = 32
    embedding_dim = 32
    attention_dim = 32
    attention_location_n_filters = 8
    attention_location_kernel_size = 3

    key = jax.random.PRNGKey(0)
    ks = jax.random.split(key, 8)

    params = {
        "Wq": 0.3 * jax.random.normal(ks[0], (attention_dim, attention_rnn_dim),
                                      jnp.float32),
        "Wm": 0.3 * jax.random.normal(ks[1], (attention_dim, embedding_dim),
                                      jnp.float32),   # memory_layer (glue only)
        "Wconv": 0.3 * jax.random.normal(
            ks[2], (attention_location_n_filters, 2,
                    attention_location_kernel_size), jnp.float32),
        "Wloc": 0.3 * jax.random.normal(
            ks[3], (attention_dim, attention_location_n_filters), jnp.float32),
        "v": 0.3 * jax.random.normal(ks[4], (1, attention_dim), jnp.float32),
    }

    query = jax.random.normal(ks[5], (B, attention_rnn_dim), jnp.float32)
    memory = jax.random.normal(ks[6], (B, T, embedding_dim), jnp.float32)
    processed_memory = memory @ params["Wm"].T
    att_raw = jax.random.uniform(ks[7], (B, 2, T), jnp.float32)
    attention_weights_cat = att_raw / jnp.sum(att_raw, axis=-1, keepdims=True)
    mask = jnp.zeros((B, T), jnp.bool_).at[1, 12:].set(True)

    # Step-invariant prep (pads, pm transpose, bias, bf16 casts) hoisted out of
    # the per-step call, as it would be in a real decoder loop.
    prepared = prepare_attention_memory(memory, processed_memory, mask)

    ctx, attw = attention_forward(query, attention_weights_cat, prepared, params)
    ctx = jax.block_until_ready(ctx)
    attw = jax.block_until_ready(attw)

    ref_ctx, ref_attw = attention_reference(query, memory, processed_memory,
                                            attention_weights_cat, mask, params)

    # memory / processed_memory are stored bf16 on the kernel path (halved HBM
    # traffic); tolerance covers that quantization, math/accumulation stay f32.
    assert np.allclose(np.asarray(attw), np.asarray(ref_attw),
                       rtol=2e-2, atol=2e-2), "attention_weights mismatch"
    assert np.allclose(np.asarray(ctx), np.asarray(ref_ctx),
                       rtol=2e-2, atol=2e-2), "attention_context mismatch"
    assert attw.shape == (B, T) and ctx.shape == (B, embedding_dim)

    print("KERNEL_OK")
</pallas_src>

<mosaic_0001>
module attributes {stable_mosaic.version = 11 : i64} {
  func.func @attention_kernel(%arg0: i32, %arg1: memref<1x32x1xf32, #tpu.memory_space<vmem>>, %arg2: memref<1x6x128xf32, #tpu.memory_space<vmem>>, %arg3: memref<1x32x128xbf16, #tpu.memory_space<vmem>>, %arg4: memref<1x1x128xf32, #tpu.memory_space<vmem>>, %arg5: memref<1x128x128xbf16, #tpu.memory_space<vmem>>, %arg6: memref<32x32xf32, #tpu.memory_space<vmem>>, %arg7: memref<32x6xf32, #tpu.memory_space<vmem>>, %arg8: memref<32x1xf32, #tpu.memory_space<vmem>>, %arg9: memref<1x1x128xf32, #tpu.memory_space<vmem>>, %arg10: memref<1x1x128xf32, #tpu.memory_space<vmem>>) attributes {dimension_semantics = [#tpu.dimension_semantics<parallel>], iteration_bounds = array<i64: 2>, scalar_prefetch = 0 : i64, scratch_operands = 0 : i64, tpu.core_type = #tpu.core_type<tc>, window_params = [{transform_indices = @transform_0, window_bounds = array<i64: 1, 32, 1>}, {transform_indices = @transform_1, window_bounds = array<i64: 1, 6, 128>}, {transform_indices = @transform_2, window_bounds = array<i64: 1, 32, 128>}, {transform_indices = @transform_3, window_bounds = array<i64: 1, 1, 128>}, {transform_indices = @transform_4, window_bounds = array<i64: 1, 128, 128>}, {pipeline_mode = #tpu.pipeline_mode<synchronous>, transform_indices = @transform_5, window_bounds = array<i64: 32, 32>}, {pipeline_mode = #tpu.pipeline_mode<synchronous>, transform_indices = @transform_6, window_bounds = array<i64: 32, 6>}, {pipeline_mode = #tpu.pipeline_mode<synchronous>, transform_indices = @transform_7, window_bounds = array<i64: 32, 1>}, {transform_indices = @transform_8, window_bounds = array<i64: 1, 1, 128>}, {transform_indices = @transform_9, window_bounds = array<i64: 1, 1, 128>}]} {
    %c0 = arith.constant 0 : index
    %c0_0 = arith.constant 0 : index
    %0 = vector.load %arg6[%c0, %c0_0] : memref<32x32xf32, #tpu.memory_space<vmem>>, vector<32x32xf32>
    %c0_1 = arith.constant 0 : index
    %c0_2 = arith.constant 0 : index
    %c0_3 = arith.constant 0 : index
    %1 = vector.load %arg1[%c0_1, %c0_2, %c0_3] : memref<1x32x1xf32, #tpu.memory_space<vmem>>, vector<1x32x1xf32>
    %2 = vector.shape_cast %1 : vector<1x32x1xf32> to vector<32x1xf32>
    %cst = arith.constant dense<0.000000e+00> : vector<32x1xf32>
    %3 = tpu.matmul %0, %2, %cst {dimension_numbers = #tpu.dot_dimension_numbers<[1], [0], [0], [1], [0, 0, 1, 1], [], []>} : vector<32x32xf32>, vector<32x1xf32>, vector<32x1xf32> -> vector<32x1xf32>
    %c0_4 = arith.constant 0 : index
    %c0_5 = arith.constant 0 : index
    %4 = vector.load %arg7[%c0_4, %c0_5] : memref<32x6xf32, #tpu.memory_space<vmem>>, vector<32x6xf32>
    %c0_6 = arith.constant 0 : index
    %c0_7 = arith.constant 0 : index
    %c0_8 = arith.constant 0 : index
    %5 = vector.load %arg2[%c0_6, %c0_7, %c0_8] : memref<1x6x128xf32, #tpu.memory_space<vmem>>, vector<1x6x128xf32>
    %6 = vector.shape_cast %5 : vector<1x6x128xf32> to vector<6x128xf32>
    %cst_9 = arith.constant dense<0.000000e+00> : vector<32x128xf32>
    %7 = tpu.matmul %4, %6, %cst_9 {dimension_numbers = #tpu.dot_dimension_numbers<[1], [0], [0], [1], [0, 0, 1, 1], [], []>} : vector<32x6xf32>, vector<6x128xf32>, vector<32x128xf32> -> vector<32x128xf32>
    %c0_10 = arith.constant 0 : index
    %c0_11 = arith.constant 0 : index
    %c0_12 = arith.constant 0 : index
    %8 = vector.load %arg3[%c0_10, %c0_11, %c0_12] : memref<1x32x128xbf16, #tpu.memory_space<vmem>>, vector<1x32x128xbf16>
    %9 = vector.shape_cast %8 : vector<1x32x128xbf16> to vector<32x128xbf16>
    %10 = arith.extf %9 : vector<32x128xbf16> to vector<32x128xf32>
    %11 = vector.broadcast %3 : vector<32x1xf32> to vector<32x128xf32>
    %12 = arith.addf %11, %7 : vector<32x128xf32>
    %13 = arith.addf %12, %10 : vector<32x128xf32>
    %14 = math.tanh %13 : vector<32x128xf32>
    %c0_13 = arith.constant 0 : index
    %c0_14 = arith.constant 0 : index
    %15 = vector.load %arg8[%c0_13, %c0_14] : memref<32x1xf32, #tpu.memory_space<vmem>>, vector<32x1xf32>
    %16 = vector.broadcast %15 : vector<32x1xf32> to vector<32x128xf32>
    %17 = arith.mulf %16, %14 : vector<32x128xf32>
    %cst_15 = arith.constant dense<0.000000e+00> : vector<128xf32>
    %18 = vector.multi_reduction <add>, %17, %cst_15 [0] : vector<32x128xf32> to vector<128xf32>
    %19 = vector.shape_cast %18 : vector<128xf32> to vector<1x128xf32>
    %c0_16 = arith.constant 0 : index
    %c0_17 = arith.constant 0 : index
    %c0_18 = arith.constant 0 : index
    %20 = vector.load %arg4[%c0_16, %c0_17, %c0_18] : memref<1x1x128xf32, #tpu.memory_space<vmem>>, vector<1x1x128xf32>
    %21 = vector.shape_cast %20 : vector<1x1x128xf32> to vector<1x128xf32>
    %22 = arith.addf %19, %21 : vector<1x128xf32>
    %cst_19 = arith.constant dense<0xFF800000> : vector<1xf32>
    %23 = vector.multi_reduction <maximumf>, %22, %cst_19 [1] : vector<1x128xf32> to vector<1xf32>
    %24 = vector.shape_cast %23 : vector<1xf32> to vector<1x1xf32>
    %25 = vector.broadcast %24 : vector<1x1xf32> to vector<1x128xf32>
    %26 = arith.subf %22, %25 : vector<1x128xf32>
    %27 = math.exp %26 : vector<1x128xf32>
    %cst_20 = arith.constant dense<0.000000e+00> : vector<1xf32>
    %28 = vector.multi_reduction <add>, %27, %cst_20 [1] : vector<1x128xf32> to vector<1xf32>
    %29 = vector.shape_cast %28 : vector<1xf32> to vector<1x1xf32>
    %30 = tpu.reciprocal %29 : vector<1x1xf32> -> vector<1x1xf32>
    %31 = vector.broadcast %30 : vector<1x1xf32> to vector<1x128xf32>
    %32 = arith.mulf %27, %31 : vector<1x128xf32>
    %c0_21 = arith.constant 0 : index
    %c0_22 = arith.constant 0 : index
    %c0_23 = arith.constant 0 : index
    %33 = vector.load %arg10[%c0_21, %c0_22, %c0_23] : memref<1x1x128xf32, #tpu.memory_space<vmem>>, vector<1x1x128xf32>
    %34 = vector.shape_cast %33 : vector<1x1x128xf32> to vector<1x128xf32>
    %35 = vector.shape_cast %32 : vector<1x128xf32> to vector<1x1x128xf32>
    tpu.vector_store %arg10[%c0_21, %c0_22, %c0_23], %35 {strides = array<i32>} : memref<1x1x128xf32, #tpu.memory_space<vmem>>, vector<1x1x128xf32>,
    %36 = arith.truncf %32 : vector<1x128xf32> to vector<1x128xbf16>
    %c0_24 = arith.constant 0 : index
    %c0_25 = arith.constant 0 : index
    %c0_26 = arith.constant 0 : index
    %37 = vector.load %arg5[%c0_24, %c0_25, %c0_26] : memref<1x128x128xbf16, #tpu.memory_space<vmem>>, vector<1x128x128xbf16>
    %38 = vector.shape_cast %37 : vector<1x128x128xbf16> to vector<128x128xbf16>
    %cst_27 = arith.constant dense<0.000000e+00> : vector<1x128xf32>
    %39 = tpu.matmul %36, %38, %cst_27 {dimension_numbers = #tpu.dot_dimension_numbers<[1], [0], [0], [1], [0, 0, 1, 1], [], []>} : vector<1x128xbf16>, vector<128x128xbf16>, vector<1x128xf32> -> vector<1x128xf32>
    %c0_28 = arith.constant 0 : index
    %c0_29 = arith.constant 0 : index
    %c0_30 = arith.constant 0 : index
    %40 = vector.load %arg9[%c0_28, %c0_29, %c0_30] : memref<1x1x128xf32, #tpu.memory_space<vmem>>, vector<1x1x128xf32>
    %41 = vector.shape_cast %40 : vector<1x1x128xf32> to vector<1x128xf32>
    %42 = vector.shape_cast %39 : vector<1x128xf32> to vector<1x1x128xf32>
    tpu.vector_store %arg9[%c0_28, %c0_29, %c0_30], %42 {strides = array<i32>} : memref<1x1x128xf32, #tpu.memory_space<vmem>>, vector<1x1x128xf32>,
    return
  }
  func.func @transform_0(%arg0: i32) -> (i32, i32, i32) {
    %c0_i32 = arith.constant 0 : i32
    %c0_i32_0 = arith.constant 0 : i32
    %c0_i32_1 = arith.constant 0 : i32
    return %arg0, %c0_i32, %c0_i32_0 : i32, i32, i32
  }
  func.func @transform_1(%arg0: i32) -> (i32, i32, i32) {
    %c0_i32 = arith.constant 0 : i32
    %c0_i32_0 = arith.constant 0 : i32
    %c0_i32_1 = arith.constant 0 : i32
    return %arg0, %c0_i32, %c0_i32_0 : i32, i32, i32
  }
  func.func @transform_2(%arg0: i32) -> (i32, i32, i32) {
    %c0_i32 = arith.constant 0 : i32
    %c0_i32_0 = arith.constant 0 : i32
    %c0_i32_1 = arith.constant 0 : i32
    return %arg0, %c0_i32, %c0_i32_0 : i32, i32, i32
  }
  func.func @transform_3(%arg0: i32) -> (i32, i32, i32) {
    %c0_i32 = arith.constant 0 : i32
    %c0_i32_0 = arith.constant 0 : i32
    %c0_i32_1 = arith.constant 0 : i32
    return %arg0, %c0_i32, %c0_i32_0 : i32, i32, i32
  }
  func.func @transform_4(%arg0: i32) -> (i32, i32, i32) {
    %c0_i32 = arith.constant 0 : i32
    %c0_i32_0 = arith.constant 0 : i32
    %c0_i32_1 = arith.constant 0 : i32
    return %arg0, %c0_i32, %c0_i32_0 : i32, i32, i32
  }
  func.func @transform_5(%arg0: i32) -> (i32, i32) {
    %c0_i32 = arith.constant 0 : i32
    %c0_i32_0 = arith.constant 0 : i32
    %c0_i32_1 = arith.constant 0 : i32
    return %c0_i32, %c0_i32_0 : i32, i32
  }
  func.func @transform_6(%arg0: i32) -> (i32, i32) {
    %c0_i32 = arith.constant 0 : i32
    %c0_i32_0 = arith.constant 0 : i32
    %c0_i32_1 = arith.constant 0 : i32
    return %c0_i32, %c0_i32_0 : i32, i32
  }
  func.func @transform_7(%arg0: i32) -> (i32, i32) {
    %c0_i32 = arith.constant 0 : i32
    %c0_i32_0 = arith.constant 0 : i32
    %c0_i32_1 = arith.constant 0 : i32
    return %c0_i32, %c0_i32_0 : i32, i32
  }
  func.func @transform_8(%arg0: i32) -> (i32, i32, i32) {
    %c0_i32 = arith.constant 0 : i32
    %c0_i32_0 = arith.constant 0 : i32
    %c0_i32_1 = arith.constant 0 : i32
    return %arg0, %c0_i32, %c0_i32_0 : i32, i32, i32
  }
  func.func @transform_9(%arg0: i32) -> (i32, i32, i32) {
    %c0_i32 = arith.constant 0 : i32
    %c0_i32_0 = arith.constant 0 : i32
    %c0_i32_1 = arith.constant 0 : i32
    return %arg0, %c0_i32, %c0_i32_0 : i32, i32, i32
  }
}

</mosaic_0001>

<bundles_post_ra>
// kernel: tpu_custom_call.1
= control target key start
LH: loop header
LB: loop body
LE: loop exit
PB: predicated region body
PF: predicated region fallthrough
CT: control target
= control target key end

     0   :  { %15 = vsyncpa [#allocation3], 0  ;;  %s1429_s0 = inlined_call_operand.vmem [shape: f32[2,32,1], index: 0, kind: input, shape index: {}]   ;;  %s1430_s1 = inlined_call_operand.vmem [shape: f32[2,6,128], index: 1, kind: input, shape index: {}]   ;;  %s1431_s2 = inlined_call_operand.vmem [shape: bf16[2,32,128], index: 2, kind: input, shape index: {}]   ;;  %s1432_s3 = inlined_call_operand.vmem [shape: f32[2,1,128], index: 3, kind: input, shape index: {}]   ;;  %s1433_s4 = inlined_call_operand.hbm [shape: bf16[2,128,128], index: 4, kind: input, shape index: {}]   ;;  %s1434_s5 = inlined_call_operand.vmem [shape: f32[32,32], index: 5, kind: input, shape index: {}]   ;;  %s1435_s6 = inlined_call_operand.vmem [shape: f32[32,6], index: 6, kind: input, shape index: {}]   ;;  %s1436_s7 = inlined_call_operand.vmem [shape: f32[32,1], index: 7, kind: input, shape index: {}]   ;;  %s1437_s8 = inlined_call_operand.hbm [shape: f32[2,1,128], index: 8, kind: output, shape index: {0}]   ;;  %s1438_s9 = inlined_call_operand.hbm [shape: f32[2,1,128], index: 9, kind: output, shape index: {1}]  }
   0x1   :  { %17 = vsyncpa [#allocation3 + $0x1], 0 }
   0x2   :  { %18 = vsyncpa [#allocation4], 0 }
   0x3   :  { %20 = vsyncpa [#allocation4 + $0x1], 0 }
   0x4   :  { %21 = vsyncpa [#allocation7], 0 }
   0x5   :  { %23 = vsyncpa [#allocation7 + $0x1], 0  ;;  %s1215_s30 = smov 0   ;;  %s1217_s10 = smov 0  }
   0x6   :  { %s1219_s11 = smov 0   ;;  %s1221_s12 = smov 0  }
   0x7 LB: > { %1442 = sst [smem:[#allocation11_spill]] %s1156_s11  ;;  %s1236_s13 = sadd.s32 4294967295, %s1160_s12   ;;  %s1160_s12 = sphi %s1221_s12, %s1451_s12   ;;  %s1156_s11 = sphi %s1219_s11, %s1453_s11   ;;  %s1152_s10 = sphi %s1217_s10, %s1455_s10   ;;  %s1148_s30 = sphi %s1215_s30, %s1454_s30  }
   0x8   : > { %s887_s14 = sadd.s32 4294967294, %s1160_s12   ;;  %s1240_s15 = sadd.s32 1, %s1160_s12  }
   0x9   : > { %1443 = sst [smem:[#allocation12_spill]] %s1240_s15  ;;  %s140_s16 = sadd.s32 1, %s1156_s11 }
   0xa   : > { %s137_s17 = ssub.s32 %s1160_s12, %s1240_s15  ;;  %p147_p0 = scmp.ne.s32.totalorder %s1156_s11, %s1152_s10 }
   0xb   : > { %p138_p1 = scmp.eq.s32.totalorder %s137_s17, 0  ;;  %p148_p2 = scmp.eq.s32.totalorder %s1160_s12, 0 }
   0xc   : > { %p153_p3 = scmp.ne.s32.totalorder %s1152_s10, %s1148_s30  ;;  %p154_p4 = scmp.eq.s32.totalorder %s1236_s13, 0 }
   0xd   : > { %s1252_s18 = scalar_select %p138_p1, %s1156_s11, %s140_s16  }
   0xe   : > { %p1254_p5 = por %p148_p2, %p147_p0  ;;  %p1258_p6 = por %p154_p4, %p153_p3 }
   0xf   : > { %1444 = sst [smem:[#allocation13_spill]] %s1252_s18  ;;  %p240_p7 = scmp.eq.s32.totalorder %s1236_s13, 1 }
  0x10   : > { %p246_p8 = scmp.eq.s32.totalorder %s887_s14, 1  ;;  %p980_p10 = scmp.lt.s32.totalorder %s1160_s12, 2 }
  0x11   : > { %p1265_p11 = por %p240_p7, %p147_p0  ;;  %s330_s23 = sand.u32 1, %s1156_s11  }
  0x12   : > { %p1269_p12 = por %p246_p8, %p153_p3  ;;  %s943_s24 = sshll.u32 %s1160_s12, 6 }
  0x13   : > { %s890_s25 = sshll.u32 %s330_s23, 6  ;;  %s339_s28 = scalar_lea.hbm %s1433_s4, %s943_s24 }
  0x14   : > { %s340_s29 = sshll.u32 %s339_s28, 4  ;;  %s334_s14 = scalar_lea.vmem [#allocation2], %s890_s25  ;;  %s341_s29 = int_to_ptr.hbm [resolvable:$true] %s340_s29 }
  0x15   : > { %s342_s16 = sshll.u32 %s334_s14, 4  ;;  %p1280_p13 = pnand %p980_p10, %p1254_p5  ;;  %s343_s16 = int_to_ptr.vmem [resolvable:$true] %s342_s16 }
  0x16   : > { %p893_p0 = scmp.ge.s32.totalorder %s1160_s12, 1  ;;  %p350_p1 = scmp.lt.s32.totalorder %s1160_s12, 3 }
  0x17   : > { %s331_s18 = scalar_lea.sflag [#allocation3], %s330_s23  ;;  %s1032_s11 = sshra.s32 %s341_s29, 4  ;;  %s1033_s11 = int_to_ptr.hbm [resolvable:$true] %s1032_s11 }
  0x18   : > { %s1034_s15 = scalar_lea.hbm %s1033_s11, 64  ;;  %p1036_p3 = pneg %p1280_p13 }
  0x19   : > { %p1035_p2 = scmp.ne.s32.totalorder %s1033_s11, %s1034_s15  ;;  %s1039_s19 = scalar_lea.hbm %s1433_s4, 128 }
  0x1a   : > { %p1040_p5 = scmp.lt.s32.totalorder %s1033_s11, %s1433_s4  ;;  %p1041_p8 = scmp.lt.s32.totalorder %s1039_s19, %s1034_s15 }
  0x1b   : > { %p1037_p4 = pnand %p1036_p3, %p1035_p2 }
  0x1c   : > { %p1042_p10 = por %p1041_p8, %p1040_p5 }
  0x1d   : > { %p1038_p7 = pneg %p1037_p4 }
  0x1f   : > { %p1043_p9 = pnand %p1042_p10, %p1038_p7 }
  0x21   : > { %1046 = shalt.err (!%p1043_p9)
}
  0x22   : > { %s1162_s23 = smov 64   ;;  %s1163_s28 = smov 4  }
  0x23   : > { %972 = dma.hbm_to_vmem [thread:$0]  (!%p1280_p13), %s341_s29, 1024, %s343_s16, %s331_s18, %s1162_s23, %s1162_s23, %s1163_s28  }
  0x24   : > { %p351_p2 = pnand %p893_p0, %p350_p1 }
  0x25   : > { %s1301_s14 = sand.u32 (!%p351_p2), 1, %s1152_s10  }
  0x26   : > { %354 = sbr.rel (%p351_p2) target bundleno = 758 (0x2f6), region = 52  ;;  %s894_s11 = sshll.u32 (!%p351_p2), %s1301_s14, 6 }
  0x27   : > { %s357_s15 = scalar_lea.sflag (!%p351_p2), [#allocation3], %s1301_s14  ;;  %s1305_s24 = scalar_lea.vmem (!%p351_p2), [#allocation2], %s894_s11 }
  0x2b   : > { %1135 = dma.done.wait (%p1258_p6), %s357_s15, 1024  }
  0x2c   : > { %1137 = vsyncadd (%p1258_p6), %s357_s15, 4294966272  ;;  %p416_p9 = scmp.lt.s32.totalorder %s1236_s13, 1  ;;  %vm501_vm0 = vcmask 1045504   ;;  %vm488_vm1 = vcmask 48128   ;;  %v1164_v2 = vmov 0   ;;  %v483_v5 = vld [vmem:[%s1435_s6] sm:$0xff] }
  0x2d   : > { %1017 = vset.pattern.permute.xlu0 %v1164_v2  ;;  %1018 = vset.pattern.permute.xlu1 %v1164_v2  ;;  %v433_v7 = vld [vmem:[%s1434_s5] sm:$0xff]  ;;  %vm441_vm2 = vcmask 261120   ;;  %v484_v8 = vld [vmem:[%s1435_s6 + $0x8] sm:$0xff]  ;;  %v435_v10 = vld [vmem:[%s1434_s5 + $0x10] sm:$0xff]  ;;  %vm613_vm3 = vcmask 1040384  }
  0x2e   : > { %s1313_s18 = scalar_select %p416_p9, %s1236_s13, 1  ;;  %1019 = vset.pattern.permute.xlu2 %v1164_v2  ;;  %v434_v9 = vld [vmem:[%s1434_s5 + $0x8] sm:$0xff]  ;;  %v436_v11 = vld [vmem:[%s1434_s5 + $0x18] sm:$0xff]  ;;  %v485_v12 = vld [vmem:[%s1435_s6 + $0x10] sm:$0xff] }
  0x2f   : > { %v486_v13 = vld [vmem:[%s1435_s6 + $0x18] sm:$0xff]  ;;  %v574_v15 = vld [vmem:[%s1436_s7] sm:$0xff]  ;;  %v575_v16 = vld [vmem:[%s1436_s7 + $0x8] sm:$0xff] }
  0x30   : > { %s944_s29 = sshll.u32 %s1313_s18, 5  ;;  %s897_s16 = sshll.u32 %s1313_s18, 3  ;;  %580 = vperm.xlu2 %1019, %v574_v15   ;;  %v576_v18 = vld [vmem:[%s1436_s7 + $0x10] sm:$0xff]  ;;  %v577_v21 = vld [vmem:[%s1436_s7 + $0x18] sm:$0xff]  ;;  %v947_v15 = vld [vmem:[%s1305_s24 + $0x8] sm:$0xff] }
  0x31   : > { %s420_s19 = scalar_lea.vmem %s1429_s0, %s944_s29  ;;  %s424_s23 = scalar_lea.vmem %s1430_s1, %s897_s16 }
  0x32   : > { %v440_v0 = vld [vmem:[%s420_s19 + $0x18] sm:$0xff]  ;;  %v439_v1 = vld [vmem:[%s420_s19 + $0x10] sm:$0xff]  ;;  %v438_v3 = vld [vmem:[%s420_s19 + $0x8] sm:$0xff]  ;;  %s945_s20 = sshll.u32 %s1313_s18, 4  ;;  %s432_s17 = scalar_lea.vmem %s1432_s3, %s1313_s18 }
  0x33   : > { %466 = vmatpush.msra.mxu0 %v440_v0  ;;  %v487_v4 = vld [vmem:[%s424_s23] sm:$0x3f]  ;;  %s429_s15 = scalar_lea.vmem %s1431_s2, %s945_s20  ;;  %s723_s23 = scalar_lea.sflag [#allocation7], %s1301_s14 }
  0x34   : > { %904 = vmatpush.msk.msra.mxu1 %vm501_vm0, %v487_v4  ;;  %v437_v6 = vld [vmem:[%s420_s19] sm:$0xff]  ;;  %v962_v28 = vld [vmem:[%s429_s15 + $0x8] sm:$0xff]   ;;  %v953_v4 = vld [vmem:[%s1305_s24 + $0x38] sm:$0xff]  ;;  %s744_s19 = scalar_lea.hbm %s1438_s9, %s1236_s13  ;;  %s1082_s29 = scalar_lea.hbm %s1438_s9, 2 }
  0x35   : > { %467 = vmatpush.msra.mxu0 %v439_v1  ;;  %905 = vmatmul.msk.f32.vlgmr.msra.gmra.mxu1 %vm488_vm1, %v483_v5  ;;  %v955_v26 = vld [vmem:[%s429_s15] sm:$0xff]   ;;  %v960_v33 = vunpack.c.l.bf16 %v962_v28  ;;  %v961_v41 = vunpack.c.h.bf16 %v962_v28  ;;  %v952_v5 = vld [vmem:[%s1305_s24 + $0x30] sm:$0xff]  ;;  %s748_s27 = sshll.u32 %s744_s19, 4  ;;  %s749_s27 = int_to_ptr.hbm [resolvable:$true] %s748_s27 }
  0x36   : > { %v957_v29 = vunpack.c.h.bf16 %v955_v26  ;;  %v956_v31 = vunpack.c.l.bf16 %v955_v26  ;;  %v611_v0 = vld [vmem:[%s432_s17] sm:$0x1]  ;;  %704 = vmatpush.bf16.msra.mxu2 %v953_v4  ;;  %s1076_s20 = sshra.s32 %s749_s27, 4  ;;  %s1077_s20 = int_to_ptr.hbm [resolvable:$true] %s1076_s20 }
  0x37   : > { %468 = vmatpush.msra.mxu0 %v438_v3  ;;  %s1078_s28 = scalar_lea.hbm %s1077_s20, 1  ;;  %p1083_p1 = scmp.lt.s32.totalorder %s1077_s20, %s1438_s9 }
  0x38   : > { %585 = vperm.xlu2 %1019, %v575_v16   ;;  %v946_v16 = vld [vmem:[%s1305_s24] sm:$0xff]  ;;  %p1079_p6 = scmp.ne.s32.totalorder %s1077_s20, %s1078_s28  ;;  %p1084_p3 = scmp.lt.s32.totalorder %s1082_s29, %s1078_s28 }
  0x39   : > { %469 = vmatpush.msra.mxu0 %v437_v6  ;;  %v951_v6 = vld [vmem:[%s1305_s24 + $0x28] sm:$0xff] }
  0x3a   : > { %900 = vmatmul.msk.f32.vlgmr.msra.gmra.mxu0 %vm441_vm2, %v433_v7  ;;  %705 = vmatpush.bf16.msra.mxu2 %v952_v5  ;;  %p1080_p13 = pnand %p1079_p6, %p1265_p11  ;;  %p1085_p4 = por %p1084_p3, %p1083_p1 }
  0x3c   : > { %p1081_p0 = pneg %p1080_p13 }
  0x3d   : > { %906 = vmatmul.msk.f32.gmra.mxu1 %vm488_vm1, %v484_v8 }
  0x3e   : > { %706 = vmatpush.bf16.msra.mxu2 %v951_v6  ;;  %p1086_p7 = pnand %p1085_p4, %p1081_p0 }
  0x42   : > { %901 = vmatmul.msk.f32.gmra.mxu0 %vm441_vm2, %v434_v9 }
  0x45   : > { %907 = vmatmul.msk.f32.gmra.mxu1 %vm488_vm1, %v485_v12  ;;  %v950_v12 = vld [vmem:[%s1305_s24 + $0x20] sm:$0xff] }
  0x46   : > { %707 = vmatpush.bf16.msra.mxu2 %v950_v12 }
  0x4a   : > { %902 = vmatmul.msk.f32.gmra.mxu0 %vm441_vm2, %v435_v10 }
  0x4d   : > { %908 = vmatmul.msk.f32.gmra.mxu1 %vm488_vm1, %v486_v13  ;;  %v949_v13 = vld [vmem:[%s1305_s24 + $0x18] sm:$0xff] }
  0x4e   : > { %708 = vmatpush.bf16.msra.mxu2 %v949_v13 }
  0x52   : > { %903 = vmatmul.msk.f32.gmra.mxu0 %vm441_vm2, %v436_v11 }
  0x8a   : > { %v581_v36 = vpop.permute.xlu2 %580 }
  0x92   : > { %v586_v45 = vpop.permute.xlu2 %585 }
  0xb2   : > { %v522_v22 = vpop.f32.mrf.mxu1 }
  0xb7   : > { %v471_v14 = vpop.f32.mrf.mxu0 }
  0xb8   : > { %544 = vperm.xlu0 %1017, %v471_v14   ;;  %v948_v14 = vld [vmem:[%s1305_s24 + $0x10] sm:$0xff]  ;;  %s415_s24 = scalar_lea.vmem [#allocation6], %s1301_s14 }
  0xb9   : > { %709 = vmatpush.bf16.msra.mxu2 %v948_v14  ;;  %s746_s26 = sshll.u32 %s415_s24, 4  ;;  %s747_s26 = int_to_ptr.vmem [resolvable:$true] %s746_s26 }
  0xba   : > { %v525_v24 = vpop.f32.mrf.mxu1 }
  0xbd   : > { %710 = vmatpush.bf16.msra.mxu2 %v947_v15 }
  0xbf   : > { %v474_v17 = vpop.f32.mrf.mxu0 }
  0xc0   : > { %549 = vperm.xlu0 %1017, %v474_v17  }
  0xc1   : > { %711 = vmatpush.bf16.msra.mxu2 %v946_v16 }
  0xc2   : > { %v528_v27 = vpop.f32.mrf.mxu1 }
  0xc7   : > { %v477_v19 = vpop.f32.mrf.mxu0 }
  0xc8   : > { %590 = vperm.xlu0 %1017, %v576_v18   ;;  %554 = vperm.xlu1 %1018, %v477_v19  }
  0xca   : > { %v531_v40 = vpop.f32.mrf.mxu1 }
  0xcf   : > { %v480_v20 = vpop.f32.mrf.mxu0 }
  0xd0   : > { %559 = vperm.xlu1 %1018, %v480_v20  }
  0xd8   : > { %595 = vperm.xlu1 %1018, %v577_v21  }
 0x12a   : > { %v545_v23 = vpop.permute.xlu0 %544 }
 0x12b   : > { %v562_v32 = vadd.f32 %v545_v23, %v522_v22 }
 0x12d   : > { %v566_v38 = vadd.f32 %v956_v31, %v562_v32 }
 0x132   : > { %v550_v25 = vpop.permute.xlu0 %549 }
 0x133   : > { %v563_v30 = vadd.f32 %v550_v25, %v525_v24 }
 0x135   : > { %v567_v35 = vadd.f32 %v957_v29, %v563_v30 }
 0x137   : > { %1020 = vtanh.f32 %v567_v35 }
 0x138   : > { %1022 = vtanh.f32 %v566_v38 }
 0x13a   : > { %v555_v34 = vpop.permute.xlu1 %554  ;;  %v591_v50 = vpop.permute.xlu0 %590 }
 0x13b   : > { %v564_v37 = vadd.f32 %v555_v34, %v528_v27 }
 0x13d   : > { %v568_v39 = vadd.f32 %v960_v33, %v564_v37  ;;  %v1021_v44 = vpop.eup %1020 }
 0x13e   : > { %v1023_v47 = vpop.eup %1022  ;;  %v599_v49 = vmul.f32 %v1021_v44, %v586_v45 }
 0x13f   : > { %1024 = vtanh.f32 %v568_v39  ;;  %v598_v51 = vmul.f32 %v1023_v47, %v581_v36 }
 0x141   : > { %v602_v53 = vadd.f32 %v599_v49, %v598_v51 }
 0x142   : > { %v560_v42 = vpop.permute.xlu1 %559 }
 0x143   : > { %v565_v43 = vadd.f32 %v560_v42, %v531_v40 }
 0x145   : > { %v569_v46 = vadd.f32 %v961_v41, %v565_v43  ;;  %v1025_v48 = vpop.eup %1024 }
 0x146   : > { %v600_v52 = vmul.f32 %v1025_v48, %v591_v50 }
 0x147   : > { %1026 = vtanh.f32 %v569_v46 }
 0x148   : > { %v603_v56 = vadd.f32 %v602_v53, %v600_v52 }
 0x14a   : > { %v596_v55 = vpop.permute.xlu1 %595 }
 0x14d   : > { %v1027_v54 = vpop.eup %1026 }
 0x14e   : > { %v601_v57 = vmul.f32 %v1027_v54, %v596_v55 }
 0x150   : > { %v604_v58 = vadd.f32 %v603_v56, %v601_v57 }
 0x152   : > { %v605_v59 = vrot.slane %v604_v58, 4 }
 0x154   : > { %v606_v60 = vadd.f32 %v605_v59, %v604_v58 }
 0x156   : > { %v607_v61 = vrot.slane %v606_v60, 2 }
 0x158   : > { %v608_v62 = vadd.f32 %v607_v61, %v606_v60 }
 0x15a   : > { %v609_v63 = vrot.slane %v608_v62, 1 }
 0x15c   : > { %v610_v1 = vadd.f32 %v609_v63, %v608_v62 }
 0x15e   : > { %v612_v2 = vadd.f32 %v611_v0, %v610_v1 }
 0x160   : > { %v614_v3 = vsel %vm613_vm3, %v612_v2, -inf }
 0x161   : > { %615 = vmax.xlane.f32.xlu2 %v614_v3 }
 0x1d4   : > { %v616_v7 = vpop.xlane.xlu2 %615 }
 0x1d5   : > { %v617_v8 = vsub.f32 %v612_v2, %v616_v7 }
 0x1d7   : > { %v618_v9 = vmul.f32 1.442695, %v617_v8 }
 0x1d9   : > { %1028 = vpow2.f32 %v618_v9 }
 0x1df   : > { %v1029_v10 = vpop.eup %1028 }
 0x1e0   : > { %v620_v11 = vsel %vm613_vm3, %v1029_v10, 0.0 }
 0x1e1   : > { %621 = vadd.xlane.f32.xlu0 %v620_v11 }
 0x254   : > { %v622_v17 = vpop.xlane.xlu0 %621 }
 0x255   : > { %1030 = vrcp.f32 %v622_v17  ;;  %v634_v21 = vand.u32 2147483648, %v622_v17  ;;  %v632_v23 = vand.u32 2147483647, %v622_v17  ;;  %vm628_vm5 = vweird.f32 %v622_v17 }
 0x257   : > { %v635_v25 = vor.u32 1.1754944e-38, %v634_v21  ;;  %vm633_vm7 = vcmp.eq.f32.partialorder %v632_v23, 8.507059e+37 }
 0x25b   : > { %v1031_v18 = vpop.eup %1030 }
 0x25c   : > { %v624_v19 = vmul.f32 %v1031_v18, %v622_v17  ;;  %vm629_vm4 = vweird.f32 %v1031_v18 }
 0x25d   : > { %vm630_vm6 = vmor %vm628_vm5, %vm629_vm4 }
 0x25e   : > { %v625_v20 = vsub.f32 1.0, %v624_v19 }
 0x260   : > { %v626_v22 = vmul.f32 %v1031_v18, %v625_v20 }
 0x262   : > { %v627_v24 = vadd.f32 %v1031_v18, %v626_v22 }
 0x264   : > { %v631_v26 = vsel %vm630_vm6, %v1031_v18, %v627_v24 }
 0x265   : > { %v636_v27 = vsel %vm633_vm7, %v635_v25, %v631_v26 }
 0x266   : > { %v637_v28 = vmul.f32 %v1029_v10, %v636_v27 }
 0x268   : > { %v639_v29 = vpack.c.bf16 %v637_v28, %v637_v28  ;;  %638 = vst [vmem:[%s415_s24] sm:$0x1] %v637_v28 }
 0x26a   : > { %712 = vmatmul.bf16.vlgmr.msra.gmra.mxu2 %v639_v29 }
 0x26b   : > { %1089 = shalt.err (!%p1086_p7)
}
 0x26c   : > { %966 = dma.vmem_to_hbm [thread:$0]  (%p1265_p11), %s747_s26, 16, %s749_s27, %s723_s23  }
 0x26d   : > { %s731_s25 = scalar_lea.hbm %s1437_s8, %s1236_s13  ;;  %s409_s19 = scalar_lea.vmem [#allocation5], %s1301_s14 }
 0x26e   : > { %s733_s11 = sshll.u32 %s409_s19, 4  ;;  %s735_s15 = sshll.u32 %s731_s25, 4  ;;  %s734_s11 = int_to_ptr.vmem [resolvable:$true] %s733_s11  ;;  %s736_s15 = int_to_ptr.hbm [resolvable:$true] %s735_s15 }
 0x26f   : > { %s719_s20 = scalar_lea.sflag [#allocation4], %s1301_s14  ;;  %s1104_s28 = sshra.s32 %s736_s15, 4  ;;  %s1105_s28 = int_to_ptr.hbm [resolvable:$true] %s1104_s28 }
 0x270   : > { %s1106_s29 = scalar_lea.hbm %s1105_s28, 1  ;;  %s1110_s23 = scalar_lea.hbm %s1437_s8, 2 }
 0x271   : > { %p1107_p5 = scmp.ne.s32.totalorder %s1105_s28, %s1106_s29  ;;  %p1111_p2 = scmp.lt.s32.totalorder %s1105_s28, %s1437_s8 }
 0x272   : > { %p1112_p9 = scmp.lt.s32.totalorder %s1110_s23, %s1106_s29 }
 0x273   : > { %p1108_p8 = pnand %p1107_p5, %p1265_p11 }
 0x274   : > { %p1113_p6 = por %p1112_p9, %p1111_p2 }
 0x275   : > { %p1109_p10 = pneg %p1108_p8 }
 0x277   : > { %p1114_p13 = pnand %p1113_p6, %p1109_p10 }
 0x2ed   : > { %v713_v30 = vpop.f32.mrf.mxu2 }
 0x2ee   : > { %717 = vst [vmem:[%s409_s19] sm:$0x1] %v713_v30 }
 0x2ef   : > { %1117 = shalt.err (!%p1114_p13)
}
 0x2f0   : > { %965 = dma.vmem_to_hbm [thread:$0]  (%p1265_p11), %s734_s11, 16, %s736_s15, %s719_s20  }
 0x2f5   : > { %v715_v31 = vpop.f32.mrf.mxu2 }
 0x2f6 PF: > { %s760_s14 = sand.u32 1, %s1148_s30   ;;  %p1450_p0 = scmp.ge.s32.totalorder %s1160_s12, 2 }
 0x2f7   : > { %s761_s17 = scalar_lea.sflag [#allocation4], %s760_s14 }
 0x2f8   : > { %p974_p1 = pnand %p1450_p0, %p1269_p12 }
 0x2fa   : > { %p975_p3 = pneg %p974_p1 }
 0x2fc   : > { %1139 = dma.done.wait (%p975_p3), %s761_s17, 16  }
 0x2fd   : > { %1141 = vsyncadd (%p975_p3), %s761_s17, 4294967280  ;;  %s770_s24 = scalar_lea.sflag [#allocation7], %s760_s14 }
 0x2fe   : > { %1143 = dma.done.wait (%p975_p3), %s770_s24, 16  }
 0x2ff   : > { %1145 = vsyncadd (%p975_p3), %s770_s24, 4294967280  ;;  %s1451_s12 = sld [smem:[#allocation12_spill]]  ;;  %s1454_s30 = smov %s1152_s10 }
 0x300   : > { %s1452_s21 = sld [smem:[#allocation11_spill]] }
 0x301   : > { %s1453_s11 = sld [smem:[#allocation13_spill]] }
 0x305   : > { %p26_p11 = scmp.ge.s32.totalorder %s1451_s12, 4  }
 0x306   : > { %s1455_s10 = smov %s1452_s21 }
 0x307   :  { %28 = sbr.rel (!%p26_p11) target bundleno = 7 (0x7), region = 126 }
 0x30c   :  { %775 = vsyncpa [#allocation3], 1 }
 0x30d   :  { %777 = vsyncpa [#allocation3 + $0x1], 1 }
 0x30e   :  { %778 = vsyncpa [#allocation4], 1 }
 0x30f   :  { %780 = vsyncpa [#allocation4 + $0x1], 1 }
 0x310   :  { %781 = vsyncpa [#allocation7], 1 }
 0x311   :  { %783 = vsyncpa [#allocation7 + $0x1], 1 }

</bundles_post_ra>
